<compile_context>
chip_gen: v7x
topology: tpu7x:2x2x1
jax: 0.10.0
libtpu: 0.0.40
codegen_flags: <defaults>
</compile_context>

<pallas_src>
import jax
import jax.numpy as jnp
from jax.experimental import pallas as pl
from jax.experimental.pallas import tpu as pltpu


def _rvq_embed_kernel(idx_ref, table_ref, cb_ref, fr_ref, out_ref):
    # idx_ref:   (TM, 1)       int32  -- flattened (b, k, l) indices for this tile
    # table_ref: (C, D)        f32    -- content embedding table (resident)
    # cb_ref:    (K, D)        f32    -- codebook embedding table (resident)
    # fr_ref:    (Lmax, D)     f32    -- frame embedding table (resident)
    # out_ref:   (nb, K, L, D) f32    -- nb whole batches per grid step
    nb, K, L, D = out_ref.shape
    TM = nb * K * L
    C = table_ref.shape[0]

    idx = idx_ref[...]                                       # (TM, 1)
    col = jax.lax.broadcasted_iota(jnp.int32, (TM, C), 1)    # (TM, C)
    onehot = (idx == col).astype(table_ref.dtype)            # (TM, C)

    # One-hot gather on the MXU: all TM rows of the tile in a single push.
    content = jnp.dot(onehot, table_ref[...],
                      preferred_element_type=jnp.float32)    # (TM, D)
    content = content.reshape(nb, K, L, D)                   # tile-aligned: D=128, L%8==0

    # In-kernel positional add: codebook[k] + frame[l] broadcast over (nb, K, L, D).
    # (VPU add is free filler; this kernel is DMA/step-overhead bound.)
    pos = cb_ref[...][None, :, None, :] + fr_ref[0:L, :][None, None, :, :]
    out_ref[...] = (content + pos).astype(out_ref.dtype)


def rvq_embeddings_with_position(index, content_w, codebook_w, frame_w,
                                 *, target_rows=512):
    """index: (B, K, L) int; tables: (C, D), (K, D), (Lmax, D) f32 -> (B, K, L, D)."""
    B, K, L = index.shape
    C, D = content_w.shape
    Kw, _ = codebook_w.shape
    Lmax, _ = frame_w.shape
    assert K == Kw, "input num codebook should be the same as defined"
    assert L <= Lmax, "input frame length should be no greater than defined"

    rows_per_batch = K * L
    # Batches per grid step: aim for >=target_rows MXU rows per push, but stay
    # a divisor of B so every block is full (at B=2, K*L=32 -> nb=2, grid=(1,)).
    nb = max(1, min(B, target_rows // rows_per_batch))
    while B % nb:
        nb -= 1
    num_tiles = B // nb
    tm = nb * rows_per_batch
    n_rows = B * rows_per_batch

    # Only wrapper-side glue: cast + flatten the (tiny) index stream.
    idx = index.astype(jnp.int32).reshape(n_rows, 1)

    return pl.pallas_call(
        _rvq_embed_kernel,
        out_shape=jax.ShapeDtypeStruct((B, K, L, D), content_w.dtype),
        grid_spec=pltpu.PrefetchScalarGridSpec(
            num_scalar_prefetch=0,
            grid=(num_tiles,),
            in_specs=[
                # all (b, k, l) indices of this tile as one (tm, 1) block
                pl.BlockSpec((tm, 1), lambda i: (i, 0)),
                # full content table, constant block index -> stays resident
                pl.BlockSpec((C, D), lambda i: (0, 0)),
                # codebook table, resident
                pl.BlockSpec((K, D), lambda i: (0, 0)),
                # frame table (full Lmax rows; kernel statically slices :L), resident
                pl.BlockSpec((Lmax, D), lambda i: (0, 0)),
            ],
            out_specs=pl.BlockSpec((nb, K, L, D), lambda i: (i, 0, 0, 0)),
        ),
        compiler_params=pltpu.CompilerParams(
            dimension_semantics=("parallel",)),
    )(idx, content_w, codebook_w, frame_w)


def _reference(index, content_w, codebook_w, frame_w):
    B, K, L = index.shape
    return (content_w[index]
            + codebook_w[None, :, None, :]
            + frame_w[None, None, :L, :])


if __name__ == "__main__":
    # Module hyperparameters (small, consistent with the forward pass).
    num_classes = 256
    num_codebooks = 4
    max_frame_len = 16
    embed_dim = 128
    B, L = 2, 8

    key = jax.random.PRNGKey(0)
    k_c, k_k, k_f, k_i = jax.random.split(key, 4)

    # Deterministic parameter init (nn.Embedding default: N(0, 1)).
    content_w = jax.random.normal(k_c, (num_classes, embed_dim), jnp.float32)
    codebook_w = jax.random.normal(k_k, (num_codebooks, embed_dim), jnp.float32)
    frame_w = jax.random.normal(k_f, (max_frame_len, embed_dim), jnp.float32)

    index = jax.random.randint(k_i, (B, num_codebooks, L), 0, num_classes,
                               dtype=jnp.int32)

    out = rvq_embeddings_with_position(index, content_w, codebook_w, frame_w)
    out = jax.block_until_ready(out)

    ref = _reference(index, content_w, codebook_w, frame_w)
    assert out.shape == (B, num_codebooks, L, embed_dim)
    assert jnp.allclose(out, ref, atol=1e-5, rtol=1e-5)

    print("KERNEL_OK")
</pallas_src>

<mosaic_0001>
module attributes {stable_mosaic.version = 11 : i64} {
  func.func @_rvq_embed_kernel(%arg0: i32, %arg1: memref<64x1xi32, #tpu.memory_space<vmem>>, %arg2: memref<256x128xf32, #tpu.memory_space<vmem>>, %arg3: memref<4x128xf32, #tpu.memory_space<vmem>>, %arg4: memref<16x128xf32, #tpu.memory_space<vmem>>, %arg5: memref<2x4x8x128xf32, #tpu.memory_space<vmem>>) attributes {dimension_semantics = [#tpu.dimension_semantics<parallel>], iteration_bounds = array<i64: 1>, scalar_prefetch = 0 : i64, scratch_operands = 0 : i64, tpu.core_type = #tpu.core_type<tc>, window_params = [{transform_indices = @transform_0, window_bounds = array<i64: 64, 1>}, {pipeline_mode = #tpu.pipeline_mode<synchronous>, transform_indices = @transform_1, window_bounds = array<i64: 256, 128>}, {pipeline_mode = #tpu.pipeline_mode<synchronous>, transform_indices = @transform_2, window_bounds = array<i64: 4, 128>}, {pipeline_mode = #tpu.pipeline_mode<synchronous>, transform_indices = @transform_3, window_bounds = array<i64: 16, 128>}, {transform_indices = @transform_4, window_bounds = array<i64: 2, 4, 8, 128>}]} {
    %c0 = arith.constant 0 : index
    %c0_0 = arith.constant 0 : index
    %0 = vector.load %arg1[%c0, %c0_0] : memref<64x1xi32, #tpu.memory_space<vmem>>, vector<64x1xi32>
    %1 = tpu.iota {dimensions = array<i32: 1>} : vector<64x256xi32>
    %2 = vector.broadcast %0 : vector<64x1xi32> to vector<64x256xi32>
    %3 = arith.cmpi eq, %2, %1 : vector<64x256xi32>
    %4 = arith.extui %3 : vector<64x256xi1> to vector<64x256xi32>
    %5 = arith.sitofp %4 : vector<64x256xi32> to vector<64x256xf32>
    %c0_1 = arith.constant 0 : index
    %c0_2 = arith.constant 0 : index
    %6 = vector.load %arg2[%c0_1, %c0_2] : memref<256x128xf32, #tpu.memory_space<vmem>>, vector<256x128xf32>
    %cst = arith.constant dense<0.000000e+00> : vector<64x128xf32>
    %7 = tpu.matmul %5, %6, %cst {dimension_numbers = #tpu.dot_dimension_numbers<[1], [0], [0], [1], [0, 0, 1, 1], [], []>} : vector<64x256xf32>, vector<256x128xf32>, vector<64x128xf32> -> vector<64x128xf32>
    %8 = vector.shape_cast %7 : vector<64x128xf32> to vector<2x4x8x128xf32>
    %c0_3 = arith.constant 0 : index
    %c0_4 = arith.constant 0 : index
    %9 = vector.load %arg3[%c0_3, %c0_4] : memref<4x128xf32, #tpu.memory_space<vmem>>, vector<4x128xf32>
    %10 = vector.shape_cast %9 : vector<4x128xf32> to vector<1x4x1x128xf32>
    %c0_5 = arith.constant 0 : index
    %c0_6 = arith.constant 0 : index
    %11 = vector.load %arg4[%c0_5, %c0_6] : memref<16x128xf32, #tpu.memory_space<vmem>>, vector<8x128xf32>
    %12 = vector.shape_cast %11 : vector<8x128xf32> to vector<1x1x8x128xf32>
    %13 = vector.broadcast %10 : vector<1x4x1x128xf32> to vector<1x4x8x128xf32>
    %14 = vector.broadcast %12 : vector<1x1x8x128xf32> to vector<1x4x8x128xf32>
    %15 = arith.addf %13, %14 : vector<1x4x8x128xf32>
    %16 = vector.broadcast %15 : vector<1x4x8x128xf32> to vector<2x4x8x128xf32>
    %17 = arith.addf %8, %16 : vector<2x4x8x128xf32>
    %c0_7 = arith.constant 0 : index
    %c0_8 = arith.constant 0 : index
    %c0_9 = arith.constant 0 : index
    %c0_10 = arith.constant 0 : index
    %18 = vector.load %arg5[%c0_7, %c0_8, %c0_9, %c0_10] : memref<2x4x8x128xf32, #tpu.memory_space<vmem>>, vector<2x4x8x128xf32>
    tpu.vector_store %arg5[%c0_7, %c0_8, %c0_9, %c0_10], %17 {strides = array<i32>} : memref<2x4x8x128xf32, #tpu.memory_space<vmem>>, vector<2x4x8x128xf32>,
    return
  }
  func.func @transform_0(%arg0: i32) -> (i32, i32) {
    %c0_i32 = arith.constant 0 : i32
    %c0_i32_0 = arith.constant 0 : i32
    return %arg0, %c0_i32 : i32, i32
  }
  func.func @transform_1(%arg0: i32) -> (i32, i32) {
    %c0_i32 = arith.constant 0 : i32
    %c0_i32_0 = arith.constant 0 : i32
    %c0_i32_1 = arith.constant 0 : i32
    return %c0_i32, %c0_i32_0 : i32, i32
  }
  func.func @transform_2(%arg0: i32) -> (i32, i32) {
    %c0_i32 = arith.constant 0 : i32
    %c0_i32_0 = arith.constant 0 : i32
    %c0_i32_1 = arith.constant 0 : i32
    return %c0_i32, %c0_i32_0 : i32, i32
  }
  func.func @transform_3(%arg0: i32) -> (i32, i32) {
    %c0_i32 = arith.constant 0 : i32
    %c0_i32_0 = arith.constant 0 : i32
    %c0_i32_1 = arith.constant 0 : i32
    return %c0_i32, %c0_i32_0 : i32, i32
  }
  func.func @transform_4(%arg0: i32) -> (i32, i32, i32, i32) {
    %c0_i32 = arith.constant 0 : i32
    %c0_i32_0 = arith.constant 0 : i32
    %c0_i32_1 = arith.constant 0 : i32
    %c0_i32_2 = arith.constant 0 : i32
    return %arg0, %c0_i32, %c0_i32_0, %c0_i32_1 : i32, i32, i32, i32
  }
}

</mosaic_0001>

<bundles_post_ra>
// kernel: tpu_custom_call.1
= control target key start
LH: loop header
LB: loop body
LE: loop exit
PB: predicated region body
PF: predicated region fallthrough
CT: control target
= control target key end

     0   :  { %9 = vsyncpa [#allocation3], 0  ;;  %s622_s0 = inlined_call_operand.vmem [shape: s32[64,1], index: 0, kind: input, shape index: {}]   ;;  %s623_s1 = inlined_call_operand.hbm [shape: f32[256,128], index: 1, kind: input, shape index: {}]   ;;  %s624_s2 = inlined_call_operand.vmem [shape: f32[4,128], index: 2, kind: input, shape index: {}]   ;;  %s625_s3 = inlined_call_operand.vmem [shape: f32[16,128], index: 3, kind: input, shape index: {}]   ;;  %s626_s4 = inlined_call_operand.hbm [shape: f32[2,4,8,128], index: 4, kind: output, shape index: {}]  }
   0x1   :  { %10 = vsyncpa [#allocation4], 0  ;;  %s530_s15 = smov [#allocation2]   ;;  %s482_s19 = scalar_lea.hbm %s623_s1, 4096 }
   0x2   :  { %s18_s16 = sshll.u32 %s530_s15, 4  ;;  %p483_p0 = scmp.ne.s32.totalorder %s623_s1, %s482_s19  ;;  %s19_s16 = int_to_ptr.vmem [resolvable:$true] %s18_s16 }
   0x3   :  { %p486_p1 = scmp.lt.u32.totalorder %s482_s19, %s623_s1 }
   0x5   :  { %p488_p2 = pnand %p486_p1, %p483_p0 }
   0x7   :  { %491 = shalt.err (!%p488_p2)
}
   0x8   :  { %s492_s24 = scalar_lea.vmem %s19_s16, 4096  ;;  %p497_p4 = scmp.lt.s32.totalorder %s19_s16, %s19_s16 }
   0x9   :  { %p493_p3 = scmp.ne.s32.totalorder %s19_s16, %s492_s24  ;;  %p498_p5 = scmp.lt.s32.totalorder %s492_s24, %s492_s24 }
   0xb   :  { %p499_p6 = por %p498_p5, %p497_p4 }
   0xd   :  { %p500_p7 = pnand %p499_p6, %p493_p3 }
   0xf   :  { %503 = shalt.err (!%p500_p7)
}
  0x10   :  { %s531_s25 = smov 128   ;;  %s532_s26 = smov 8  }
  0x11   :  { %24 = dma.hbm_to_vmem [thread:$0]  %s623_s1, 4096, %s19_s16, [#allocation3], %s531_s25, %s531_s25, %s532_s26  }
  0x12   :  { %526 = dma.done.wait [#allocation3], 4096  }
  0x13   :  { %527 = vsyncadd [#allocation3], 4294963200  ;;  %v533_v0 = vmov 0   ;;  %v33_v1 = vld [vmem:[%s622_s0 + $0x8] sm:$0xff]  ;;  %v32_v2 = vld [vmem:[%s622_s0] sm:$0xff]  ;;  %v40_v57 = vlaneseq  ;;  %v534_v62 = vmov 1.0  }
  0x14   :  { %481 = vset.pattern.permute.xlu1 %v533_v0  ;;  %480 = vset.pattern.permute.xlu0 %v533_v0  ;;  %v37_v3 = vld [vmem:[%s622_s0 + $0x28] sm:$0xff]  ;;  %v36_v4 = vld [vmem:[%s622_s0 + $0x20] sm:$0xff]  ;;  %v131_v5 = vld [vmem:[#allocation2 + $0x80] sm:$0xff] }
  0x15   :  { %47 = vperm.xlu1 %481, %v33_v1   ;;  %44 = vperm.xlu0 %480, %v32_v2   ;;  %v132_v6 = vld [vmem:[#allocation2 + $0x88] sm:$0xff]  ;;  %v115_v7 = vld [vmem:[#allocation2] sm:$0xff]  ;;  %v133_v11 = vld [vmem:[#allocation2 + $0x90] sm:$0xff]  ;;  %v41_v58 = vand.u32 127, %v40_v57 }
  0x16   :  { %v116_v8 = vld [vmem:[#allocation2 + $0x8] sm:$0xff]  ;;  %v425_v9 = vpack.c.bf16 %v132_v6, %v131_v5  ;;  %v134_v12 = vld [vmem:[#allocation2 + $0x98] sm:$0xff]  ;;  %v117_v13 = vld [vmem:[#allocation2 + $0x10] sm:$0xff]  ;;  %v535_v5 = vmov 1966171168  }
  0x17   :  { %v427_v10 = vpack.c.bf16 %v116_v8, %v115_v7  ;;  %v429_v14 = vpack.c.bf16 %v134_v12, %v133_v11  ;;  %v118_v15 = vld [vmem:[#allocation2 + $0x18] sm:$0xff]  ;;  %v135_v16 = vld [vmem:[#allocation2 + $0xa0] sm:$0xff]  ;;  %v136_v17 = vld [vmem:[#allocation2 + $0xa8] sm:$0xff]  ;;  %v42_v59 = vadd.s32 128, %v41_v58  ;;  %v263_v6 = vunpack.c.l.s4 %v535_v5 }
  0x18   :  { %v38_v18 = vld [vmem:[%s622_s0 + $0x30] sm:$0xff]  ;;  %426 = vmatprep.subr.bf16.mxu0 %v425_v9  ;;  %457 = vmatprep.subr.bf16.mxu1 %v425_v9  ;;  %v431_v20 = vpack.c.bf16 %v118_v15, %v117_v13  ;;  %v433_v21 = vpack.c.bf16 %v136_v17, %v135_v16  ;;  %v119_v22 = vld [vmem:[#allocation2 + $0x20] sm:$0xff]  ;;  %v120_v23 = vld [vmem:[#allocation2 + $0x28] sm:$0xff]  ;;  %v266_v8 = vshrl.u32 %v40_v57, 7 }
  0x19   :  { %59 = vperm.xlu1 %481, %v37_v3   ;;  %56 = vperm.xlu0 %480, %v36_v4   ;;  %v34_v19 = vld [vmem:[%s622_s0 + $0x10] sm:$0xff]  ;;  %v137_v24 = vld [vmem:[#allocation2 + $0xb0] sm:$0xff]  ;;  %v39_v26 = vld [vmem:[%s622_s0 + $0x38] sm:$0xff]  ;;  %v435_v28 = vpack.c.bf16 %v120_v23, %v119_v22  ;;  %v264_v7 = vunpack.c.0.s8 %v263_v6 }
  0x1a   :  { %428 = vmatpush3.bf16.msra.mxu0 %v427_v10  ;;  %465 = vmatpush3.bf16.msra.mxu1 %v427_v10  ;;  %v138_v25 = vld [vmem:[#allocation2 + $0xb8] sm:$0xff]  ;;  %v35_v27 = vld [vmem:[%s622_s0 + $0x18] sm:$0xff]  ;;  %v121_v30 = vld [vmem:[#allocation2 + $0x30] sm:$0xff]  ;;  %v281_v12 = vsub.s32 0, %v266_v8 }
  0x1b   :  { %430 = vmatprep.subr.bf16.mxu0 %v429_v14  ;;  %458 = vmatprep.subr.bf16.mxu1 %v429_v14  ;;  %v437_v29 = vpack.c.bf16 %v138_v25, %v137_v24  ;;  %v122_v31 = vld [vmem:[#allocation2 + $0x38] sm:$0xff]  ;;  %v139_v32 = vld [vmem:[#allocation2 + $0xc0] sm:$0xff]  ;;  %v140_v33 = vld [vmem:[#allocation2 + $0xc8] sm:$0xff]  ;;  %v267_v9 = vsub.s32 %v264_v7, %v266_v8 }
  0x1c   :  { %v439_v34 = vpack.c.bf16 %v122_v31, %v121_v30  ;;  %v441_v35 = vpack.c.bf16 %v140_v33, %v139_v32  ;;  %v123_v36 = vld [vmem:[#allocation2 + $0x40] sm:$0xff]  ;;  %v124_v37 = vld [vmem:[#allocation2 + $0x48] sm:$0xff]  ;;  %v141_v38 = vld [vmem:[#allocation2 + $0xd0] sm:$0xff] }
  0x1d   :  { %62 = vperm.xlu1 %481, %v38_v18   ;;  %50 = vperm.xlu0 %480, %v34_v19   ;;  %v142_v39 = vld [vmem:[#allocation2 + $0xd8] sm:$0xff]  ;;  %v443_v40 = vpack.c.bf16 %v124_v37, %v123_v36  ;;  %v125_v42 = vld [vmem:[#allocation2 + $0x50] sm:$0xff]  ;;  %v143_v44 = vld [vmem:[#allocation2 + $0xe0] sm:$0xff] }
  0x1e   :  { %432 = vmatpush3.bf16.msra.mxu0 %v431_v20  ;;  %466 = vmatpush3.bf16.msra.mxu1 %v431_v20  ;;  %v445_v41 = vpack.c.bf16 %v142_v39, %v141_v38  ;;  %v126_v43 = vld [vmem:[#allocation2 + $0x58] sm:$0xff]  ;;  %v144_v45 = vld [vmem:[#allocation2 + $0xe8] sm:$0xff]  ;;  %v127_v48 = vld [vmem:[#allocation2 + $0x60] sm:$0xff] }
  0x1f   :  { %434 = vmatprep.subr.bf16.mxu0 %v433_v21  ;;  %459 = vmatprep.subr.bf16.mxu1 %v433_v21  ;;  %v447_v46 = vpack.c.bf16 %v126_v43, %v125_v42  ;;  %v449_v47 = vpack.c.bf16 %v144_v45, %v143_v44  ;;  %v128_v49 = vld [vmem:[#allocation2 + $0x68] sm:$0xff]  ;;  %v145_v50 = vld [vmem:[#allocation2 + $0xf0] sm:$0xff]  ;;  %v146_v51 = vld [vmem:[#allocation2 + $0xf8] sm:$0xff] }
  0x20   :  { %v451_v52 = vpack.c.bf16 %v128_v49, %v127_v48  ;;  %v453_v53 = vpack.c.bf16 %v146_v51, %v145_v50  ;;  %v129_v54 = vld [vmem:[#allocation2 + $0x70] sm:$0xff]  ;;  %v130_v55 = vld [vmem:[#allocation2 + $0x78] sm:$0xff]  ;;  %v368_v10 = vld.sshfl [vmem:[%s624_s2] sm:$0x33 pattern:$0x75316420] }
  0x21   :  { %65 = vperm.xlu1 %481, %v39_v26   ;;  %53 = vperm.xlu0 %480, %v35_v27   ;;  %v455_v56 = vpack.c.bf16 %v130_v55, %v129_v54  ;;  %v268_v11 = vrot.slane %v368_v10, %v267_v9  ;;  %v261_v13 = vcombine.high %v368_v10, %v368_v10  ;;  %v278_v16 = vld [vmem:[%s625_s3] sm:$0xff]  ;;  %s536_s2 = smov [#allocation5]  }
  0x22   :  { %436 = vmatpush3.bf16.msra.mxu0 %v435_v28  ;;  %467 = vmatpush3.bf16.msra.mxu1 %v435_v28  ;;  %s324_s3 = sshll.u32 %s536_s2, 4  ;;  %s325_s3 = int_to_ptr.vmem [resolvable:$true] %s324_s3 }
  0x23   :  { %438 = vmatprep.subr.bf16.mxu0 %v437_v29  ;;  %460 = vmatprep.subr.bf16.mxu1 %v437_v29  ;;  %v282_v14 = vrot.slane %v268_v11, %v281_v12  ;;  %v275_v15 = vrot.slane %v261_v13, %v267_v9  ;;  %v276_v20 = vcombine.high %v268_v11, %v268_v11  ;;  %s504_s21 = scalar_lea.vmem %s325_s3, 1024  ;;  %p509_p9 = scmp.lt.s32.totalorder %s325_s3, %s325_s3 }
  0x24   :  { %p505_p8 = scmp.ne.s32.totalorder %s325_s3, %s504_s21  ;;  %p510_p10 = scmp.lt.s32.totalorder %s504_s21, %s504_s21 }
  0x25   :  { %v299_v18 = vadd.f32 %v282_v14, %v278_v16  ;;  %v286_v19 = vrot.slane %v275_v15, %v281_v12  ;;  %v290_v27 = vrot.slane %v276_v20, %v281_v12  ;;  %v277_v28 = vcombine.high %v275_v15, %v275_v15 }
  0x26   :  { %440 = vmatpush3.bf16.msra.mxu0 %v439_v34  ;;  %468 = vmatpush3.bf16.msra.mxu1 %v439_v34  ;;  %p511_p11 = por %p510_p10, %p509_p9 }
  0x27   :  { %442 = vmatprep.subr.bf16.mxu0 %v441_v35  ;;  %461 = vmatprep.subr.bf16.mxu1 %v441_v35  ;;  %v300_v26 = vadd.f32 %v286_v19, %v278_v16  ;;  %v301_v37 = vadd.f32 %v290_v27, %v278_v16  ;;  %v294_v38 = vrot.slane %v277_v28, %v281_v12 }
  0x28   :  { %p512_p12 = pnand %p511_p11, %p505_p8 }
  0x2a   :  { %444 = vmatpush3.bf16.msra.mxu0 %v443_v40  ;;  %469 = vmatpush3.bf16.msra.mxu1 %v443_v40 }
  0x2b   :  { %446 = vmatprep.subr.bf16.mxu0 %v445_v41  ;;  %462 = vmatprep.subr.bf16.mxu1 %v445_v41 }
  0x2e   :  { %448 = vmatpush3.bf16.msra.mxu0 %v447_v46  ;;  %470 = vmatpush3.bf16.msra.mxu1 %v447_v46 }
  0x2f   :  { %450 = vmatprep.subr.bf16.mxu0 %v449_v47  ;;  %463 = vmatprep.subr.bf16.mxu1 %v449_v47  ;;  %v302_v47 = vadd.f32 %v294_v38, %v278_v16 }
  0x32   :  { %452 = vmatpush3.bf16.msra.mxu0 %v451_v52  ;;  %471 = vmatpush3.bf16.msra.mxu1 %v451_v52 }
  0x33   :  { %454 = vmatprep.subr.bf16.mxu0 %v453_v53  ;;  %464 = vmatprep.subr.bf16.mxu1 %v453_v53 }
  0x36   :  { %456 = vmatpush3.bf16.msra.mxu0 %v455_v56  ;;  %472 = vmatpush3.bf16.msra.mxu1 %v455_v56 }
  0x94   :  { %v48_v60 = vpop.permute.xlu1 %47  ;;  %v45_v61 = vpop.permute.xlu0 %44 }
  0x95   :  { %vm70_vm0 = vcmp.eq.s32.totalorder %v48_v60, %v42_v59  ;;  %vm67_vm1 = vcmp.eq.s32.totalorder %v45_v61, %v41_v58  ;;  %vm68_vm2 = vcmp.eq.s32.totalorder %v45_v61, %v42_v59  ;;  %vm69_vm3 = vcmp.eq.s32.totalorder %v48_v60, %v41_v58 }
  0x96   :  { %352 = vmatprep.mubr.msk.f32.mxu0 %vm68_vm2, %v534_v62 }
  0x97   :  { %353 = vmatmul.mubr.msk.f32.vlgmr.msra.gmra.mrb[0].mxu0 %vm67_vm1, %v534_v62 }
  0x98   :  { %v60_v63 = vpop.permute.xlu1 %59  ;;  %v57_v0 = vpop.permute.xlu0 %56  ;;  %354 = vmatprep.mubr.msk.f32.mxu0 %vm70_vm0, %v534_v62 }
  0x99   :  { %vm75_vm4 = vcmp.eq.s32.totalorder %v57_v0, %v41_v58  ;;  %vm76_vm5 = vcmp.eq.s32.totalorder %v57_v0, %v42_v59  ;;  %vm78_vm6 = vcmp.eq.s32.totalorder %v60_v63, %v42_v59  ;;  %vm77_vm9 = vcmp.eq.s32.totalorder %v60_v63, %v41_v58 }
  0x9a   :  { %360 = vmatprep.mubr.msk.f32.mxu1 %vm76_vm5, %v534_v62 }
  0x9b   :  { %355 = vmatmul.mubr.msk.f32.gmra.mrb[2].mxu0 %vm69_vm3, %v534_v62  ;;  %361 = vmatmul.mubr.msk.f32.vlgmr.msra.gmra.mrb[0].mxu1 %vm75_vm4, %v534_v62 }
  0x9c   :  { %v63_v1 = vpop.permute.xlu1 %62  ;;  %362 = vmatprep.mubr.msk.f32.mxu1 %vm78_vm6, %v534_v62  ;;  %v51_v2 = vpop.permute.xlu0 %50 }
  0x9d   :  { %vm71_vm7 = vcmp.eq.s32.totalorder %v51_v2, %v41_v58  ;;  %vm72_vm8 = vcmp.eq.s32.totalorder %v51_v2, %v42_v59  ;;  %vm80_vm10 = vcmp.eq.s32.totalorder %v63_v1, %v42_v59  ;;  %vm79_vm13 = vcmp.eq.s32.totalorder %v63_v1, %v41_v58 }
  0x9e   :  { %356 = vmatprep.mubr.msk.f32.mxu0 %vm72_vm8, %v534_v62 }
  0x9f   :  { %357 = vmatmul.mubr.msk.f32.gmra.mrb[4].mxu0 %vm71_vm7, %v534_v62  ;;  %363 = vmatmul.mubr.msk.f32.gmra.mrb[2].mxu1 %vm77_vm9, %v534_v62 }
  0xa0   :  { %v66_v3 = vpop.permute.xlu1 %65  ;;  %364 = vmatprep.mubr.msk.f32.mxu1 %vm80_vm10, %v534_v62  ;;  %v54_v4 = vpop.permute.xlu0 %53 }
  0xa1   :  { %vm73_vm11 = vcmp.eq.s32.totalorder %v54_v4, %v41_v58  ;;  %vm74_vm12 = vcmp.eq.s32.totalorder %v54_v4, %v42_v59  ;;  %vm82_vm14 = vcmp.eq.s32.totalorder %v66_v3, %v42_v59  ;;  %vm81_vm15 = vcmp.eq.s32.totalorder %v66_v3, %v41_v58 }
  0xa2   :  { %358 = vmatprep.mubr.msk.f32.mxu0 %vm74_vm12, %v534_v62 }
  0xa3   :  { %359 = vmatmul.mubr.msk.f32.gmra.mrb[6].mxu0 %vm73_vm11, %v534_v62  ;;  %365 = vmatmul.mubr.msk.f32.gmra.mrb[4].mxu1 %vm79_vm13, %v534_v62 }
  0xa4   :  { %366 = vmatprep.mubr.msk.f32.mxu1 %vm82_vm14, %v534_v62 }
  0xa7   :  { %367 = vmatmul.mubr.msk.f32.gmra.mrb[6].mxu1 %vm81_vm15, %v534_v62 }
 0x16a   :  { %v401_v17 = vpop.f32.mrb[0].mxu0 }
 0x16b   :  { %v402_v21 = vpop.f32.mrb[1].mxu0 }
 0x16c   :  { %v403_v22 = vadd.f32 %v402_v21, %v401_v17 }
 0x16e   :  { %v303_v23 = vadd.f32 %v403_v22, %v299_v18  ;;  %v404_v24 = vpop.f32.mrb[2].mxu0  ;;  %v413_v25 = vpop.f32.mrb[0].mxu1 }
 0x16f   :  { %v405_v29 = vpop.f32.mrb[3].mxu0  ;;  %v414_v30 = vpop.f32.mrb[1].mxu1 }
 0x170   :  { %311 = vst [vmem:[#allocation5] sm:$0xff] %v303_v23  ;;  %v406_v31 = vadd.f32 %v405_v29, %v404_v24  ;;  %v415_v32 = vadd.f32 %v414_v30, %v413_v25 }
 0x172   :  { %v304_v33 = vadd.f32 %v406_v31, %v300_v26  ;;  %v307_v34 = vadd.f32 %v415_v32, %v299_v18  ;;  %v407_v35 = vpop.f32.mrb[4].mxu0  ;;  %v416_v36 = vpop.f32.mrb[2].mxu1 }
 0x173   :  { %v408_v39 = vpop.f32.mrb[5].mxu0  ;;  %v417_v40 = vpop.f32.mrb[3].mxu1 }
 0x174   :  { %312 = vst [vmem:[#allocation5 + $0x8] sm:$0xff] %v304_v33  ;;  %315 = vst [vmem:[#allocation5 + $0x20] sm:$0xff] %v307_v34  ;;  %v409_v41 = vadd.f32 %v408_v39, %v407_v35  ;;  %v418_v42 = vadd.f32 %v417_v40, %v416_v36 }
 0x176   :  { %v305_v43 = vadd.f32 %v409_v41, %v301_v37  ;;  %v308_v44 = vadd.f32 %v418_v42, %v300_v26  ;;  %v410_v45 = vpop.f32.mrb[6].mxu0  ;;  %v419_v46 = vpop.f32.mrb[4].mxu1 }
 0x177   :  { %v411_v48 = vpop.f32.mrb[7].mxu0  ;;  %v420_v49 = vpop.f32.mrb[5].mxu1 }
 0x178   :  { %313 = vst [vmem:[#allocation5 + $0x10] sm:$0xff] %v305_v43  ;;  %316 = vst [vmem:[#allocation5 + $0x28] sm:$0xff] %v308_v44  ;;  %v412_v50 = vadd.f32 %v411_v48, %v410_v45  ;;  %v421_v51 = vadd.f32 %v420_v49, %v419_v46 }
 0x17a   :  { %v306_v52 = vadd.f32 %v412_v50, %v302_v47  ;;  %v309_v53 = vadd.f32 %v421_v51, %v301_v37  ;;  %v422_v54 = vpop.f32.mrb[6].mxu1 }
 0x17b   :  { %v423_v55 = vpop.f32.mrb[7].mxu1 }
 0x17c   :  { %314 = vst [vmem:[#allocation5 + $0x18] sm:$0xff] %v306_v52  ;;  %317 = vst [vmem:[#allocation5 + $0x30] sm:$0xff] %v309_v53  ;;  %v424_v56 = vadd.f32 %v423_v55, %v422_v54 }
 0x17e   :  { %v310_v57 = vadd.f32 %v424_v56, %v302_v47 }
 0x180   :  { %318 = vst [vmem:[#allocation5 + $0x38] sm:$0xff] %v310_v57 }
 0x181   :  { %515 = shalt.err (!%p512_p12)
}
 0x182   :  { %s516_s24 = scalar_lea.hbm %s626_s4, 1024 }
 0x183   :  { %p517_p13 = scmp.ne.s32.totalorder %s626_s4, %s516_s24  ;;  %p520_p0 = scmp.lt.u32.totalorder %s516_s24, %s626_s4 }
 0x185   :  { %p522_p1 = pnand %p520_p0, %p517_p13 }
 0x187   :  { %525 = shalt.err (!%p522_p1)
}
 0x188   :  { %330 = dma.vmem_to_hbm [thread:$0]  %s325_s3, 1024, %s626_s4, [#allocation4], %s531_s25, %s531_s25, %s532_s26  }
 0x189   :  { %528 = dma.done.wait [#allocation4], 1024  }
 0x18a   :  { %529 = vsyncadd [#allocation4], 4294966272 }
 0x18b   :  { %334 = vsyncpa [#allocation3], 1 }
 0x18c   :  { %335 = vsyncpa [#allocation4], 1 }

</bundles_post_ra>
